<compile_context>
chip_gen: v6e
topology: v6e:2x2x1
jax: 0.10.0
libtpu: 0.0.40
codegen_flags: <defaults>
</compile_context>

<pallas_src>
import jax
import jax.numpy as jnp
from jax import lax
from jax.experimental import pallas as pl
from jax.experimental.pallas import tpu as pltpu


# --------------------------------------------------------------------------
# Kernels
# --------------------------------------------------------------------------

def _layernorm_kernel(eps, inv_features):
    """Whole feature axis in one block: single-pass per row tile."""
    def kernel(x_ref, w_ref, b_ref, o_ref):
        x = x_ref[...].astype(jnp.float32)
        mean = jnp.sum(x, axis=-1, keepdims=True) * inv_features
        centered = x - mean
        var = jnp.sum(centered * centered, axis=-1, keepdims=True) * inv_features
        inv = lax.rsqrt(var + eps)
        # w/b are f32 (converted once in the wrapper) and block-resident.
        y = centered * inv * w_ref[...] + b_ref[...]
        o_ref[...] = y.astype(o_ref.dtype)
    return kernel


def _layernorm_stats_kernel(features, eps, feat_tile):
    """Pass 1 of the feature-chunked path: per-row mean/rstd accumulated across
    feature chunks with a Chan/Welford parallel combine (numerically safe)."""
    def kernel(x_ref, mean_ref, rstd_ref, cnt_sc, mean_sc, m2_sc):
        c = pl.program_id(1)

        @pl.when(c == 0)
        def _():
            cnt_sc[...] = jnp.zeros_like(cnt_sc)
            mean_sc[...] = jnp.zeros_like(mean_sc)
            m2_sc[...] = jnp.zeros_like(m2_sc)

        x = x_ref[...].astype(jnp.float32)
        # Mask columns past `features` (partial last feature chunk).
        col = lax.broadcasted_iota(jnp.int32, x.shape, 1) + c * feat_tile
        valid = col < features
        xv = jnp.where(valid, x, 0.0)
        n_c = jnp.sum(valid.astype(jnp.float32), axis=-1, keepdims=True)

        chunk_mean = jnp.sum(xv, axis=-1, keepdims=True) / n_c
        centered = jnp.where(valid, x - chunk_mean, 0.0)
        chunk_m2 = jnp.sum(centered * centered, axis=-1, keepdims=True)

        n_a = cnt_sc[...]
        n_new = n_a + n_c
        delta = chunk_mean - mean_sc[...]
        mean_sc[...] = mean_sc[...] + delta * (n_c / n_new)
        m2_sc[...] = m2_sc[...] + chunk_m2 + (delta * delta) * (n_a * n_c / n_new)
        cnt_sc[...] = n_new

        @pl.when(c == pl.num_programs(1) - 1)
        def _():
            mean_ref[...] = mean_sc[...]
            var = m2_sc[...] / cnt_sc[...]
            rstd_ref[...] = lax.rsqrt(var + eps)
    return kernel


def _layernorm_apply_kernel():
    """Pass 2 of the feature-chunked path: normalize one (row, feature) tile."""
    def kernel(x_ref, mean_ref, rstd_ref, w_ref, b_ref, o_ref):
        x = x_ref[...].astype(jnp.float32)
        y = (x - mean_ref[...]) * rstd_ref[...] * w_ref[...] + b_ref[...]
        o_ref[...] = y.astype(o_ref.dtype)
    return kernel


# --------------------------------------------------------------------------
# Tiling heuristics
# --------------------------------------------------------------------------

_SUBLANE = {4: 8, 2: 16, 1: 32}
_MIN_SPLIT_ROWS = 512       # never shrink tiles below this to add grid steps
_TILE_BUDGET_FRAC = 0.75    # fraction of per-TC VMEM the charged bytes may use


def _round_up(x, m):
    return -(-x // m) * m


def _tpu_info():
    """(vmem_capacity_bytes per TC, is_v5e)."""
    vmem = None
    try:
        vmem = int(pltpu.get_tpu_info().vmem_capacity_bytes)
    except Exception:
        vmem = None
    kind = ""
    try:
        kind = jax.devices()[0].device_kind.lower()
    except Exception:
        pass
    is_v5e = ("v5 lite" in kind) or ("v5e" in kind) or ("v5litepod" in kind)
    if vmem is None:
        # Generation-aware fallback: only v7x has 64 MiB/TC; v5e/v6e have 128.
        vmem = (64 << 20) if "v7" in kind else (128 << 20)
    return vmem, is_v5e


def _choose_row_tile(rows, features, dtype, vmem_bytes, max_tile):
    itemsize = jnp.dtype(dtype).itemsize
    sublane = _SUBLANE.get(itemsize, 8)
    padded_rows = _round_up(rows, sublane)

    # For narrow feature dims, let row tiles grow past the nominal cap so each
    # DMA step moves at least ~2 MiB (amortizes the ~0.35us per-step overhead).
    min_tile_bytes = 2 << 20
    if features * itemsize * max_tile < min_tile_bytes:
        max_tile = _round_up(min_tile_bytes // max(features * itemsize, 1), sublane)

    # Bytes charged per row: x + out (each double-buffered by the pipeline) in
    # the input dtype, plus the f32 working copies the body keeps live.  For
    # f32 inputs the .astype() is free (~2 live f32 temporaries: centered / y);
    # sub-32-bit inputs also materialize the f32 upcast (~3 temporaries).
    n_f32_tmp = 2 if itemsize >= 4 else 3
    per_row_bytes = 4 * features * itemsize + n_f32_tmp * features * 4
    cap = int(_TILE_BUDGET_FRAC * vmem_bytes) // max(per_row_bytes, 1)

    row_tile = max(sublane, min(max_tile, cap))
    row_tile = (row_tile // sublane) * sublane
    row_tile = min(row_tile, padded_rows)

    # v7x megacore: guarantee >= 2 grid steps so dimension_semantics="parallel"
    # shards rows across both TensorCores -- but only when each half still has
    # >= _MIN_SPLIT_ROWS rows (harmless on single-TC v5e/v6e).
    if padded_rows >= 2 * _MIN_SPLIT_ROWS:
        half = _round_up(-(-padded_rows // 2), sublane)
        row_tile = min(row_tile, half)

    # Prefer an even number of steps (balances the two v7x TCs) when that does
    # not drop the tile below the 512-row roofline knee.
    steps = -(-padded_rows // row_tile)
    if steps > 1 and steps % 2 == 1:
        cand = _round_up(-(-padded_rows // (steps + 1)), sublane)
        if cand >= _MIN_SPLIT_ROWS:
            row_tile = cand

    return row_tile, itemsize, sublane, padded_rows


def _choose_wide_params(rows, features, itemsize, sublane, vmem_bytes):
    padded_rows = _round_up(rows, sublane)
    row_tile = min(_MIN_SPLIT_ROWS, padded_rows)
    row_tile = max(sublane, (row_tile // sublane) * sublane)
    # Charge x + out (double-buffered) plus ~3 f32 temporaries per element.
    per_elem = 4 * itemsize + 3 * 4
    feat_tile = int(_TILE_BUDGET_FRAC * vmem_bytes) // max(row_tile * per_elem, 1)
    feat_tile = max(512, (feat_tile // 128) * 128)
    feat_tile = min(feat_tile, _round_up(features, 128))
    return row_tile, feat_tile


# --------------------------------------------------------------------------
# Wrappers
# --------------------------------------------------------------------------

def _layer_norm_wide(x2d, w2d, b2d, eps, row_tile, feat_tile, vmem_bytes):
    """Feature-chunked two-pass LayerNorm for very wide rows."""
    rows, features = x2d.shape
    n_row_blocks = pl.cdiv(rows, row_tile)
    n_feat_blocks = pl.cdiv(features, feat_tile)

    itemsize = jnp.dtype(x2d.dtype).itemsize
    x_tile_bytes = row_tile * feat_tile * itemsize
    f32_tile_bytes = row_tile * feat_tile * 4
    vmem_limit = int(2 * 2 * x_tile_bytes + 3 * f32_tile_bytes
                     + 4 * feat_tile * 4 + (8 << 20))
    vmem_limit = max(16 << 20, min(vmem_limit, vmem_bytes - (8 << 20)))

    mean, rstd = pl.pallas_call(
        _layernorm_stats_kernel(features, eps, feat_tile),
        out_shape=(jax.ShapeDtypeStruct((rows, 1), jnp.float32),
                   jax.ShapeDtypeStruct((rows, 1), jnp.float32)),
        grid_spec=pltpu.PrefetchScalarGridSpec(
            num_scalar_prefetch=0,
            grid=(n_row_blocks, n_feat_blocks),
            in_specs=[pl.BlockSpec((row_tile, feat_tile), lambda i, c: (i, c))],
            out_specs=[pl.BlockSpec((row_tile, 1), lambda i, c: (i, 0)),
                       pl.BlockSpec((row_tile, 1), lambda i, c: (i, 0))],
            scratch_shapes=[pltpu.VMEM((row_tile, 1), jnp.float32)] * 3,
        ),
        compiler_params=pltpu.CompilerParams(
            dimension_semantics=("parallel", "arbitrary"),
            vmem_limit_bytes=int(vmem_limit),
        ),
    )(x2d)

    out = pl.pallas_call(
        _layernorm_apply_kernel(),
        out_shape=jax.ShapeDtypeStruct((rows, features), x2d.dtype),
        grid_spec=pltpu.PrefetchScalarGridSpec(
            num_scalar_prefetch=0,
            grid=(n_row_blocks, n_feat_blocks),
            in_specs=[pl.BlockSpec((row_tile, feat_tile), lambda i, c: (i, c)),
                      pl.BlockSpec((row_tile, 1), lambda i, c: (i, 0)),
                      pl.BlockSpec((row_tile, 1), lambda i, c: (i, 0)),
                      pl.BlockSpec((1, feat_tile), lambda i, c: (0, c)),
                      pl.BlockSpec((1, feat_tile), lambda i, c: (0, c))],
            out_specs=pl.BlockSpec((row_tile, feat_tile), lambda i, c: (i, c)),
        ),
        compiler_params=pltpu.CompilerParams(
            dimension_semantics=("parallel", "arbitrary"),
            vmem_limit_bytes=int(vmem_limit),
        ),
    )(x2d, mean, rstd, w2d, b2d)
    return out


def layer_norm_pallas(x, weight, bias, eps=1e-6):
    """LayerNorm over the last axis of x.

    x:      [..., features]
    weight: [features]
    bias:   [features]
    """
    orig_shape = x.shape
    features = orig_shape[-1]
    rows = 1
    for d in orig_shape[:-1]:
        rows *= d
    x2d = x.reshape(rows, features)

    vmem_bytes, is_v5e = _tpu_info()
    max_tile = 512 if is_v5e else 1024   # v5e's HBM saturates at ~512-row tiles
    row_tile, itemsize, sublane, padded_rows = _choose_row_tile(
        rows, features, x.dtype, vmem_bytes, max_tile)

    # weight/bias converted once to f32 (no per-step recast inside the kernel).
    w2d = weight.astype(jnp.float32).reshape(1, features)
    b2d = bias.astype(jnp.float32).reshape(1, features)

    # Very wide rows: if VMEM forces the row tile below ~256 rows even though
    # plenty of rows exist, take the feature-chunked two-pass path so we stay
    # out of the per-step-overhead-bound regime.
    if row_tile < min(256, padded_rows) and features >= 1024:
        wide_rt, feat_tile = _choose_wide_params(
            rows, features, itemsize, sublane, vmem_bytes)
        out = _layer_norm_wide(x2d, w2d, b2d, eps, wide_rt, feat_tile, vmem_bytes)
        return out.reshape(orig_shape)

    grid_steps = pl.cdiv(rows, row_tile)

    # Explicit scoped-VMEM limit (default cap is far below physical capacity);
    # keep >= 8 MiB in reserve under the per-TC capacity.
    tile_bytes = row_tile * features * itemsize
    f32_tile_bytes = row_tile * features * 4
    n_f32_tmp = 2 if itemsize >= 4 else 3
    vmem_limit = (2 * 2 * tile_bytes          # x + out, double-buffered
                  + n_f32_tmp * f32_tile_bytes  # f32 temporaries in the body
                  + 4 * features * 4            # weight/bias blocks
                  + (8 << 20))                  # compiler scratch headroom
    vmem_limit = max(16 << 20, min(int(vmem_limit), vmem_bytes - (8 << 20)))

    # If a config is stuck with small tiles, a third input buffer hides the
    # exposed per-step DMA latency; large tiles keep default double-buffering.
    if row_tile < 256 and grid_steps >= 3:
        x_spec = pl.BlockSpec((row_tile, features), lambda i: (i, 0),
                              pipeline_mode=pl.Buffered(3))
    else:
        x_spec = pl.BlockSpec((row_tile, features), lambda i: (i, 0))

    out = pl.pallas_call(
        _layernorm_kernel(eps, 1.0 / float(features)),
        out_shape=jax.ShapeDtypeStruct((rows, features), x.dtype),
        grid_spec=pltpu.PrefetchScalarGridSpec(
            num_scalar_prefetch=0,
            grid=(grid_steps,),
            in_specs=[
                x_spec,
                pl.BlockSpec((1, features), lambda i: (0, 0)),
                pl.BlockSpec((1, features), lambda i: (0, 0)),
            ],
            out_specs=pl.BlockSpec((row_tile, features), lambda i: (i, 0)),
        ),
        compiler_params=pltpu.CompilerParams(
            dimension_semantics=("parallel",),
            vmem_limit_bytes=int(vmem_limit),
        ),
    )(x2d, w2d, b2d)

    return out.reshape(orig_shape)


# --------------------------------------------------------------------------
# Self-test
# --------------------------------------------------------------------------

def _reference_layernorm(x, weight, bias, eps):
    mean = jnp.mean(x, axis=-1, keepdims=True)
    var = jnp.mean((x - mean) ** 2, axis=-1, keepdims=True)
    return (x - mean) / jnp.sqrt(var + eps) * weight + bias


if __name__ == "__main__":
    key = jax.random.PRNGKey(0)
    k1, k2, k3, k4 = jax.random.split(key, 4)
    eps = 1e-6

    # --- Test 1: module-sized input through the standard path ---------------
    batch, seq, features = 2, 8, 32
    x = jax.random.normal(k1, (batch, seq, features), dtype=jnp.float32)
    weight = jnp.ones((features,), dtype=jnp.float32)   # nn.LayerNorm init
    bias = jnp.zeros((features,), dtype=jnp.float32)

    out = layer_norm_pallas(x, weight, bias, eps=eps)
    out = jax.block_until_ready(out)
    ref = _reference_layernorm(x, weight, bias, eps)
    assert out.shape == x.shape
    assert jnp.allclose(out, ref, atol=1e-5, rtol=1e-5)

    # --- Test 2: exercise the feature-chunked two-pass path (small, forced) -
    rows2, features2 = 24, 384         # partial row block + partial feat chunk
    x2 = jax.random.normal(k2, (rows2, features2), dtype=jnp.float32)
    w2 = jax.random.normal(k3, (features2,), dtype=jnp.float32)
    b2 = 0.1 * jax.random.normal(k4, (features2,), dtype=jnp.float32)

    vmem_bytes, _ = _tpu_info()
    out2 = _layer_norm_wide(
        x2,
        w2.astype(jnp.float32).reshape(1, features2),
        b2.astype(jnp.float32).reshape(1, features2),
        eps, row_tile=16, feat_tile=256, vmem_bytes=vmem_bytes)
    out2 = jax.block_until_ready(out2)
    ref2 = _reference_layernorm(x2, w2, b2, eps)
    assert out2.shape == x2.shape
    assert jnp.allclose(out2, ref2, atol=1e-5, rtol=1e-5)

    print("KERNEL_OK")
</pallas_src>

<mosaic_0001>
module attributes {stable_mosaic.version = 11 : i64} {
  func.func @kernel(%arg0: i32, %arg1: memref<16x32xf32, #tpu.memory_space<vmem>>, %arg2: memref<1x32xf32, #tpu.memory_space<vmem>>, %arg3: memref<1x32xf32, #tpu.memory_space<vmem>>, %arg4: memref<16x32xf32, #tpu.memory_space<vmem>>) attributes {dimension_semantics = [#tpu.dimension_semantics<parallel>], iteration_bounds = array<i64: 1>, scalar_prefetch = 0 : i64, scratch_operands = 0 : i64, tpu.core_type = #tpu.core_type<tc>, window_params = [{transform_indices = @transform_0, window_bounds = array<i64: 16, 32>}, {pipeline_mode = #tpu.pipeline_mode<synchronous>, transform_indices = @transform_1, window_bounds = array<i64: 1, 32>}, {pipeline_mode = #tpu.pipeline_mode<synchronous>, transform_indices = @transform_2, window_bounds = array<i64: 1, 32>}, {transform_indices = @transform_3, window_bounds = array<i64: 16, 32>}]} {
    %c0 = arith.constant 0 : index
    %c0_0 = arith.constant 0 : index
    %0 = vector.load %arg1[%c0, %c0_0] : memref<16x32xf32, #tpu.memory_space<vmem>>, vector<16x32xf32>
    %cst = arith.constant dense<0.000000e+00> : vector<16xf32>
    %1 = vector.multi_reduction <add>, %0, %cst [1] : vector<16x32xf32> to vector<16xf32>
    %2 = vector.shape_cast %1 : vector<16xf32> to vector<16x1xf32>
    %cst_1 = arith.constant 3.125000e-02 : f32
    %3 = vector.broadcast %cst_1 : f32 to vector<16x1xf32>
    %4 = arith.mulf %2, %3 : vector<16x1xf32>
    %5 = vector.broadcast %4 : vector<16x1xf32> to vector<16x32xf32>
    %6 = arith.subf %0, %5 : vector<16x32xf32>
    %7 = arith.mulf %6, %6 : vector<16x32xf32>
    %cst_2 = arith.constant dense<0.000000e+00> : vector<16xf32>
    %8 = vector.multi_reduction <add>, %7, %cst_2 [1] : vector<16x32xf32> to vector<16xf32>
    %9 = vector.shape_cast %8 : vector<16xf32> to vector<16x1xf32>
    %cst_3 = arith.constant 3.125000e-02 : f32
    %10 = vector.broadcast %cst_3 : f32 to vector<16x1xf32>
    %11 = arith.mulf %9, %10 : vector<16x1xf32>
    %cst_4 = arith.constant 9.99999997E-7 : f32
    %12 = vector.broadcast %cst_4 : f32 to vector<16x1xf32>
    %13 = arith.addf %11, %12 : vector<16x1xf32>
    %14 = math.rsqrt %13 : vector<16x1xf32>
    %15 = vector.broadcast %14 : vector<16x1xf32> to vector<16x32xf32>
    %16 = arith.mulf %6, %15 : vector<16x32xf32>
    %c0_5 = arith.constant 0 : index
    %c0_6 = arith.constant 0 : index
    %17 = vector.load %arg2[%c0_5, %c0_6] : memref<1x32xf32, #tpu.memory_space<vmem>>, vector<1x32xf32>
    %18 = vector.broadcast %17 : vector<1x32xf32> to vector<16x32xf32>
    %19 = arith.mulf %16, %18 : vector<16x32xf32>
    %c0_7 = arith.constant 0 : index
    %c0_8 = arith.constant 0 : index
    %20 = vector.load %arg3[%c0_7, %c0_8] : memref<1x32xf32, #tpu.memory_space<vmem>>, vector<1x32xf32>
    %21 = vector.broadcast %20 : vector<1x32xf32> to vector<16x32xf32>
    %22 = arith.addf %19, %21 : vector<16x32xf32>
    %c0_9 = arith.constant 0 : index
    %c0_10 = arith.constant 0 : index
    %23 = vector.load %arg4[%c0_9, %c0_10] : memref<16x32xf32, #tpu.memory_space<vmem>>, vector<16x32xf32>
    tpu.vector_store %arg4[%c0_9, %c0_10], %22 {strides = array<i32>} : memref<16x32xf32, #tpu.memory_space<vmem>>, vector<16x32xf32>,
    return
  }
  func.func @transform_0(%arg0: i32) -> (i32, i32) {
    %c0_i32 = arith.constant 0 : i32
    %c0_i32_0 = arith.constant 0 : i32
    return %arg0, %c0_i32 : i32, i32
  }
  func.func @transform_1(%arg0: i32) -> (i32, i32) {
    %c0_i32 = arith.constant 0 : i32
    %c0_i32_0 = arith.constant 0 : i32
    %c0_i32_1 = arith.constant 0 : i32
    return %c0_i32, %c0_i32_0 : i32, i32
  }
  func.func @transform_2(%arg0: i32) -> (i32, i32) {
    %c0_i32 = arith.constant 0 : i32
    %c0_i32_0 = arith.constant 0 : i32
    %c0_i32_1 = arith.constant 0 : i32
    return %c0_i32, %c0_i32_0 : i32, i32
  }
  func.func @transform_3(%arg0: i32) -> (i32, i32) {
    %c0_i32 = arith.constant 0 : i32
    %c0_i32_0 = arith.constant 0 : i32
    return %arg0, %c0_i32 : i32, i32
  }
}

</mosaic_0001>

<bundles_post_ra>
// kernel: tpu_custom_call.1
= control target key start
LH: loop header
LB: loop body
LE: loop exit
PB: predicated region body
PF: predicated region fallthrough
CT: control target
= control target key end

     0   :  { %8 = vsyncpa [#allocation3], 0  ;;  %s197_s0 = inlined_call_operand.hbm [shape: f32[16,32], index: 0, kind: input, shape index: {}]   ;;  %s198_s1 = inlined_call_operand.vmem [shape: f32[1,32], index: 1, kind: input, shape index: {}]   ;;  %s199_s2 = inlined_call_operand.vmem [shape: f32[1,32], index: 2, kind: input, shape index: {}]   ;;  %s200_s3 = inlined_call_operand.hbm [shape: f32[16,32], index: 3, kind: output, shape index: {}]  }
   0x1   :  { %9 = vsyncpa [#allocation4], 0  ;;  %s149_s12 = smov [#allocation2]  }
   0x2   :  { %s15_s13 = sshll.u32 %s149_s12, 4  ;;  %s16_s13 = int_to_ptr.vmem [resolvable:$true] %s15_s13 }
   0x3   :  { %s113_s14 = scalar_lea.vmem %s16_s13, 256  ;;  %p118_p1 = scmp.lt.s32.totalorder %s16_s13, %s16_s13 }
   0x4   :  { %p114_p0 = scmp.ne.s32.totalorder %s16_s13, %s113_s14  ;;  %p119_p2 = scmp.lt.s32.totalorder %s113_s14, %s113_s14 }
   0x6   :  { %p120_p3 = por %p119_p2, %p118_p1 }
   0x8   :  { %p121_p4 = pnand %p120_p3, %p114_p0 }
   0xa   :  { %124 = shalt.err (!%p121_p4)
}
   0xb   :  { %s150_s15 = smov 128   ;;  %s151_s16 = smov 8  }
   0xc   :  { %21 = dma.hbm_to_vmem [thread:$0]  %s197_s0, 256, %s16_s13, [#allocation3], %s150_s15, %s150_s15, %s151_s16  }
   0xd   :  { %145 = dma.done.wait [#allocation3], 256  }
   0xe   :  { %146 = vsyncadd [#allocation3], 4294967040  ;;  %vm31_vm0 = vcmask 261120   ;;  %v29_v0 = vld [vmem:[#allocation2] sm:$0xff]  ;;  %v30_v1 = vld [vmem:[#allocation2 + $0x8] sm:$0xff]  ;;  %s152_s22 = smov [#allocation5]  }
   0xf   :  { %v32_v2 = vsel %vm31_vm0, %v29_v0, 0.0  ;;  %v35_v3 = vsel %vm31_vm0, %v30_v1, 0.0  ;;  %v95_v21 = vld [vmem:[%s198_s1] ss:$0 sm:$0xff]  ;;  %s83_s23 = sshll.u32 %s152_s22, 4  ;;  %s84_s23 = int_to_ptr.vmem [resolvable:$true] %s83_s23 }
  0x10   :  { %33 = vadd.xlane.f32.xlu0 %v32_v2  ;;  %v96_v23 = vld [vmem:[%s199_s2] ss:$0 sm:$0xff]  ;;  %s125_s24 = scalar_lea.vmem %s84_s23, 256  ;;  %p130_p6 = scmp.lt.s32.totalorder %s84_s23, %s84_s23 }
  0x11   :  { %p126_p5 = scmp.ne.s32.totalorder %s84_s23, %s125_s24  ;;  %p131_p7 = scmp.lt.s32.totalorder %s125_s24, %s125_s24 }
  0x13   :  { %p132_p8 = por %p131_p7, %p130_p6 }
  0x14   :  { %36 = vadd.xlane.f32.xlu0 %v35_v3 }
  0x15   :  { %p133_p9 = pnand %p132_p8, %p126_p5 }
  0x99   :  { %v34_v4 = vpop.xlane.xlu0 %33 }
  0x9a   :  { %v38_v5 = vmul.f32 0.03125, %v34_v4 }
  0x9c   :  { %v40_v6 = vsub.f32 %v29_v0, %v38_v5 }
  0x9d   :  { %v37_v7 = vpop.xlane.xlu0 %36 }
  0x9e   :  { %v39_v8 = vmul.f32 0.03125, %v37_v7  ;;  %v42_v9 = vmul.f32 %v40_v6, %v40_v6 }
  0xa0   :  { %v41_v10 = vsub.f32 %v30_v1, %v39_v8  ;;  %v44_v11 = vsel %vm31_vm0, %v42_v9, 0.0 }
  0xa1   :  { %45 = vadd.xlane.f32.xlu1 %v44_v11 }
  0xa2   :  { %v43_v12 = vmul.f32 %v41_v10, %v41_v10 }
  0xa4   :  { %v47_v13 = vsel %vm31_vm0, %v43_v12, 0.0 }
  0xa5   :  { %48 = vadd.xlane.f32.xlu1 %v47_v13 }
 0x12a   :  { %v46_v14 = vpop.xlane.xlu1 %45 }
 0x12b   :  { %v50_v15 = vmul.f32 0.03125, %v46_v14 }
 0x12d   :  { %v52_v16 = vadd.f32 1e-06, %v50_v15 }
 0x12e   :  { %v49_v17 = vpop.xlane.xlu1 %48 }
 0x12f   :  { %101 = vrsqrt.f32 %v52_v16  ;;  %v51_v18 = vmul.f32 0.03125, %v49_v17 }
 0x131   :  { %v53_v19 = vadd.f32 1e-06, %v51_v18 }
 0x133   :  { %103 = vrsqrt.f32 %v53_v19 }
 0x13c   :  { %v102_v20 = vpop.eup %101 }
 0x13d   :  { %v56_v22 = vmul.f32 %v102_v20, %v40_v6 }
 0x13f   :  { %v65_v24 = vmul.f32 %v95_v21, %v56_v22 }
 0x140   :  { %v104_v25 = vpop.eup %103 }
 0x141   :  { %v57_v26 = vmul.f32 %v104_v25, %v41_v10  ;;  %v74_v27 = vadd.f32 %v96_v23, %v65_v24 }
 0x143   :  { %v66_v28 = vmul.f32 %v95_v21, %v57_v26  ;;  %76 = vst.msk [vmem:[#allocation5] sm:$0xff] %vm31_vm0, %v74_v27 }
 0x145   :  { %v75_v29 = vadd.f32 %v96_v23, %v66_v28 }
 0x147   :  { %77 = vst.msk [vmem:[#allocation5 + $0x8] sm:$0xff] %vm31_vm0, %v75_v29 }
 0x148   :  { %136 = shalt.err (!%p133_p9)
}
 0x149   :  { %89 = dma.vmem_to_hbm [thread:$0]  %s84_s23, 256, %s200_s3, [#allocation4], %s150_s15, %s150_s15, %s151_s16  }
 0x14a   :  { %147 = dma.done.wait [#allocation4], 256  }
 0x14b   :  { %148 = vsyncadd [#allocation4], 4294967040 }
 0x14c   :  { %93 = vsyncpa [#allocation3], 1 }
 0x14d   :  { %94 = vsyncpa [#allocation4], 1 }

</bundles_post_ra>
